<compile_context>
chip_gen: v7x
topology: tpu7x:2x2x1
jax: 0.10.0
libtpu: 0.0.40
codegen_flags: <defaults>
</compile_context>

<pallas_src>
import math

import jax
import jax.numpy as jnp
import numpy as np
from jax.experimental import pallas as pl
from jax.experimental.pallas import tpu as pltpu


def _round_up(a, b):
    return (a + b - 1) // b * b


def _fused_conv_kernel(scale_ref, w_ref, x_ref, b_ref, o_ref):
    """One fused GEMM per M-tile.

    scale_ref : (1,)        f32 SMEM   W_std / sqrt(fan_in)
    w_ref     : (Coutp, K)  bf16       weight noise, K = KH*KW*Cin (contraction dim)
    x_ref     : (K, TM)     bf16       im2col tile, lane dim = TM (lane-dense)
    b_ref     : (Coutp, 1)  f32        b_std * bias noise (pre-folded)
    o_ref     : (Coutp, TM) f32        output tile, written exactly once
    """
    acc = jnp.dot(w_ref[...], x_ref[...], preferred_element_type=jnp.float32)
    o_ref[...] = acc * scale_ref[0] + b_ref[...]


def hierarchical_conv2d_forward(x, params, key, *, out_channels, kernel_size,
                                stride=1, padding=0, dilation=1, bias=True,
                                scaled_variance=True, eps=1e-8,
                                compute_dtype=jnp.bfloat16, tm_target=1024):
    n, cin, h, w = x.shape
    kh = kw = kernel_size
    cout = out_channels

    kg_w, kg_b, kn_w, kn_b = jax.random.split(key, 4)

    # ----- hierarchical std resampling (Gamma reparameterization) -- JAX glue
    w_shape_sp = jax.nn.softplus(params["W_shape"])[0]
    w_rate_sp = jax.nn.softplus(params["W_rate"])[0]
    inv_w_var = jax.random.gamma(kg_w, w_shape_sp) / w_rate_sp
    w_std = 1.0 / (jnp.sqrt(inv_w_var) + eps)

    if bias:
        b_shape_sp = jax.nn.softplus(params["b_shape"])[0]
        b_rate_sp = jax.nn.softplus(params["b_rate"])[0]
        inv_b_var = jax.random.gamma(kg_b, b_shape_sp) / b_rate_sp
        b_std = 1.0 / (jnp.sqrt(inv_b_var) + eps)
    else:
        b_std = jnp.float32(0.0)

    # ----- weight / bias noise (same shapes as the torch module)
    w_noise = jax.random.normal(kn_w, (cout, cin, kh, kw), dtype=jnp.float32)
    b_noise = (jax.random.normal(kn_b, (cout,), dtype=jnp.float32)
               if bias else jnp.zeros((cout,), jnp.float32))

    inv_fan = (1.0 / math.sqrt(cin * kh * kw)) if scaled_variance else 1.0

    # ----- im2col: collapse KH*KW*Cin into the contraction dim, M in the lanes
    oh = (h + 2 * padding - dilation * (kh - 1) - 1) // stride + 1
    ow = (w + 2 * padding - dilation * (kw - 1) - 1) // stride + 1
    m = n * oh * ow
    kdim = kh * kw * cin

    x_lp = x.astype(compute_dtype)
    x_pad = jnp.pad(x_lp, ((0, 0), (0, 0), (padding, padding), (padding, padding)))

    cols = []
    for ih in range(kh):
        for iw in range(kw):
            h0 = ih * dilation
            w0 = iw * dilation
            p = x_pad[:, :, h0:h0 + (oh - 1) * stride + 1:stride,
                            w0:w0 + (ow - 1) * stride + 1:stride]   # (N,Cin,OH,OW)
            cols.append(p.transpose(1, 0, 2, 3))                    # (Cin,N,OH,OW)
    # (KH*KW, Cin, N, OH, OW) -> (K, M); K index = tap*Cin + cin
    xpt = jnp.stack(cols, axis=0).reshape(kdim, m)

    # weight noise (Cout, Cin, KH, KW) -> (Cout, KH*KW*Cin), matching K ordering
    w2d = jnp.transpose(w_noise, (0, 2, 3, 1)).reshape(cout, kdim).astype(compute_dtype)
    b_eff = (b_std * b_noise).reshape(cout, 1).astype(jnp.float32)   # tiny, pre-folded
    scale = jnp.reshape(w_std * jnp.float32(inv_fan), (1,)).astype(jnp.float32)

    # Pad Cout to a multiple of 8 so output stores are sublane-unmasked.
    coutp = max(8, _round_up(cout, 8))
    if coutp != cout:
        w2d = jnp.pad(w2d, ((0, coutp - cout), (0, 0)))
        b_eff = jnp.pad(b_eff, ((0, coutp - cout), (0, 0)))

    # ----- M tiling: lane-dense tiles (multiples of 128), parallel grid axis.
    #       Pick the biggest tile that keeps double-buffered blocks in VMEM budget.
    vmem_budget = 44 << 20

    def _fits(t):
        need = 2 * (coutp * kdim * 2        # weight noise (bf16), double buffered
                    + kdim * t * 2          # im2col tile (bf16)
                    + coutp * t * 4         # output tile (f32)
                    + coutp * 4)            # bias block (f32)
        return need <= vmem_budget

    tm = min(_round_up(m, 128), _round_up(tm_target, 128))
    while tm > 128 and not _fits(tm):
        tm -= 128

    m_pad = _round_up(m, tm)
    if m_pad != m:
        xpt = jnp.pad(xpt, ((0, 0), (0, m_pad - m)))
    n_tiles = m_pad // tm

    need_bytes = 2 * (coutp * kdim * 2 + kdim * tm * 2 + coutp * tm * 4 + coutp * 4)
    vmem_limit = int(min(56 << 20, max(32 << 20, need_bytes + (4 << 20))))

    cost = pl.CostEstimate(
        flops=2 * m_pad * kdim * coutp,
        transcendentals=0,
        bytes_accessed=(xpt.size * xpt.dtype.itemsize
                        + w2d.size * w2d.dtype.itemsize
                        + b_eff.size * 4
                        + coutp * m_pad * 4))

    out_t = pl.pallas_call(
        _fused_conv_kernel,
        out_shape=jax.ShapeDtypeStruct((coutp, m_pad), jnp.float32),
        grid=(n_tiles,),
        in_specs=[
            pl.BlockSpec(memory_space=pltpu.MemorySpace.SMEM),      # fused scale scalar
            pl.BlockSpec((coutp, kdim), lambda i: (0, 0)),          # weight noise
            pl.BlockSpec((kdim, tm), lambda i: (0, i)),             # im2col tile
            pl.BlockSpec((coutp, 1), lambda i: (0, 0)),             # pre-folded bias
        ],
        out_specs=pl.BlockSpec((coutp, tm), lambda i: (0, i)),
        compiler_params=pltpu.CompilerParams(
            dimension_semantics=("parallel",),
            vmem_limit_bytes=vmem_limit),
        cost_estimate=cost,
    )(scale, w2d, xpt, b_eff)

    out = out_t[:cout, :m].reshape(cout, n, oh, ow).transpose(1, 0, 2, 3)   # NCHW

    aux = dict(w_std=w_std, b_std=b_std, w_noise=w_noise, b_noise=b_noise,
               inv_fan=inv_fan)
    return out, aux


if __name__ == "__main__":
    key = jax.random.PRNGKey(0)
    k_x, k_fwd = jax.random.split(key)

    N, Cin, H, W = 2, 4, 16, 16
    Cout, K = 8, 3

    x = jax.random.normal(k_x, (N, Cin, H, W), dtype=jnp.float32)

    # deterministic parameter init: torch.ones(1) * default(=1.0)
    params = {
        "W_shape": jnp.ones((1,), jnp.float32),
        "W_rate": jnp.ones((1,), jnp.float32),
        "b_shape": jnp.ones((1,), jnp.float32),
        "b_rate": jnp.ones((1,), jnp.float32),
    }

    out, aux = hierarchical_conv2d_forward(
        x, params, k_fwd, out_channels=Cout, kernel_size=K,
        stride=1, padding=1, dilation=1, bias=True, scaled_variance=True)
    out = jax.block_until_ready(out)

    # pure-JAX reference with the exact same sampled noise / std and the same
    # bf16 conv inputs + f32 accumulation as the kernel.
    ref = jax.lax.conv_general_dilated(
        x.astype(jnp.bfloat16), aux["w_noise"].astype(jnp.bfloat16),
        window_strides=(1, 1), padding=((1, 1), (1, 1)),
        rhs_dilation=(1, 1), dimension_numbers=("NCHW", "OIHW", "NCHW"),
        preferred_element_type=jnp.float32)
    ref = ref * (aux["w_std"] * aux["inv_fan"]) \
          + (aux["b_std"] * aux["b_noise"])[None, :, None, None]

    assert out.shape == (N, Cout, H, W)
    np.testing.assert_allclose(np.asarray(out), np.asarray(ref),
                               rtol=1e-3, atol=1e-3)
    print("KERNEL_OK")
</pallas_src>

<mosaic_0001>
module attributes {stable_mosaic.version = 11 : i64} {
  func.func @_fused_conv_kernel(%arg0: i32, %arg1: memref<1xf32, #tpu.memory_space<smem>>, %arg2: memref<8x36xbf16, #tpu.memory_space<vmem>>, %arg3: memref<36x512xbf16, #tpu.memory_space<vmem>>, %arg4: memref<8x1xf32, #tpu.memory_space<vmem>>, %arg5: memref<8x512xf32, #tpu.memory_space<vmem>>) attributes {dimension_semantics = [#tpu.dimension_semantics<parallel>], iteration_bounds = array<i64: 1>, scalar_prefetch = 0 : i64, scratch_operands = 0 : i64, tpu.core_type = #tpu.core_type<tc>, window_params = [{transform_indices = @transform_0, window_bounds = array<i64: 1>}, {pipeline_mode = #tpu.pipeline_mode<synchronous>, transform_indices = @transform_1, window_bounds = array<i64: 8, 36>}, {transform_indices = @transform_2, window_bounds = array<i64: 36, 512>}, {pipeline_mode = #tpu.pipeline_mode<synchronous>, transform_indices = @transform_3, window_bounds = array<i64: 8, 1>}, {transform_indices = @transform_4, window_bounds = array<i64: 8, 512>}]} {
    %c0 = arith.constant 0 : index
    %c0_0 = arith.constant 0 : index
    %0 = vector.load %arg2[%c0, %c0_0] : memref<8x36xbf16, #tpu.memory_space<vmem>>, vector<8x36xbf16>
    %c0_1 = arith.constant 0 : index
    %c0_2 = arith.constant 0 : index
    %1 = vector.load %arg3[%c0_1, %c0_2] : memref<36x512xbf16, #tpu.memory_space<vmem>>, vector<36x512xbf16>
    %cst = arith.constant dense<0.000000e+00> : vector<8x512xf32>
    %2 = tpu.matmul %0, %1, %cst {dimension_numbers = #tpu.dot_dimension_numbers<[1], [0], [0], [1], [0, 0, 1, 1], [], []>} : vector<8x36xbf16>, vector<36x512xbf16>, vector<8x512xf32> -> vector<8x512xf32>
    %c0_3 = arith.constant 0 : index
    %3 = memref.load %arg1[%c0_3] : memref<1xf32, #tpu.memory_space<smem>>
    %4 = vector.broadcast %3 : f32 to vector<8x512xf32>
    %5 = arith.mulf %2, %4 : vector<8x512xf32>
    %c0_4 = arith.constant 0 : index
    %c0_5 = arith.constant 0 : index
    %6 = vector.load %arg4[%c0_4, %c0_5] : memref<8x1xf32, #tpu.memory_space<vmem>>, vector<8x1xf32>
    %7 = vector.broadcast %6 : vector<8x1xf32> to vector<8x512xf32>
    %8 = arith.addf %5, %7 : vector<8x512xf32>
    %c0_6 = arith.constant 0 : index
    %c0_7 = arith.constant 0 : index
    %9 = vector.load %arg5[%c0_6, %c0_7] : memref<8x512xf32, #tpu.memory_space<vmem>>, vector<8x512xf32>
    tpu.vector_store %arg5[%c0_6, %c0_7], %8 {strides = array<i32>} : memref<8x512xf32, #tpu.memory_space<vmem>>, vector<8x512xf32>,
    return
  }
  func.func @transform_0(%arg0: i32) -> i32 {
    %c0_i32 = arith.constant 0 : i32
    %c0_i32_0 = arith.constant 0 : i32
    return %c0_i32 : i32
  }
  func.func @transform_1(%arg0: i32) -> (i32, i32) {
    %c0_i32 = arith.constant 0 : i32
    %c0_i32_0 = arith.constant 0 : i32
    %c0_i32_1 = arith.constant 0 : i32
    return %c0_i32, %c0_i32_0 : i32, i32
  }
  func.func @transform_2(%arg0: i32) -> (i32, i32) {
    %c0_i32 = arith.constant 0 : i32
    %c0_i32_0 = arith.constant 0 : i32
    return %c0_i32, %arg0 : i32, i32
  }
  func.func @transform_3(%arg0: i32) -> (i32, i32) {
    %c0_i32 = arith.constant 0 : i32
    %c0_i32_0 = arith.constant 0 : i32
    %c0_i32_1 = arith.constant 0 : i32
    return %c0_i32, %c0_i32_0 : i32, i32
  }
  func.func @transform_4(%arg0: i32) -> (i32, i32) {
    %c0_i32 = arith.constant 0 : i32
    %c0_i32_0 = arith.constant 0 : i32
    return %c0_i32, %arg0 : i32, i32
  }
}

</mosaic_0001>

<bundles_post_ra>
// kernel: tpu_custom_call.1
= control target key start
LH: loop header
LB: loop body
LE: loop exit
PB: predicated region body
PF: predicated region fallthrough
CT: control target
= control target key end

     0   :  { %10 = vsyncpa [#allocation4], 0  ;;  %s382_s0 = inlined_call_operand.<no memory space> [shape: f32[1], index: 0, kind: input, shape index: {}]   ;;  %s383_s1 = inlined_call_operand.vmem [shape: bf16[8,36], index: 1, kind: input, shape index: {}]   ;;  %s384_s2 = inlined_call_operand.hbm [shape: bf16[36,512], index: 2, kind: input, shape index: {}]   ;;  %s385_s3 = inlined_call_operand.vmem [shape: f32[8,1], index: 3, kind: input, shape index: {}]   ;;  %s386_s4 = inlined_call_operand.hbm [shape: f32[8,512], index: 4, kind: output, shape index: {}]  }
   0x1   :  { %11 = vsyncpa [#allocation5], 0  ;;  %s315_s15 = smov [#allocation3]   ;;  %s267_s19 = scalar_lea.hbm %s384_s2, 1280 }
   0x2   :  { %s21_s16 = sshll.u32 %s315_s15, 4  ;;  %p268_p0 = scmp.ne.s32.totalorder %s384_s2, %s267_s19  ;;  %s22_s16 = int_to_ptr.vmem [resolvable:$true] %s21_s16 }
   0x3   :  { %p271_p1 = scmp.lt.u32.totalorder %s267_s19, %s384_s2 }
   0x5   :  { %p273_p2 = pnand %p271_p1, %p268_p0 }
   0x7   :  { %276 = shalt.err (!%p273_p2)
}
   0x8   :  { %s277_s24 = scalar_lea.vmem %s22_s16, 1280  ;;  %p282_p4 = scmp.lt.s32.totalorder %s22_s16, %s22_s16 }
   0x9   :  { %p278_p3 = scmp.ne.s32.totalorder %s22_s16, %s277_s24  ;;  %p283_p5 = scmp.lt.s32.totalorder %s277_s24, %s277_s24 }
   0xb   :  { %p284_p6 = por %p283_p5, %p282_p4 }
   0xd   :  { %p285_p7 = pnand %p284_p6, %p278_p3 }
   0xf   :  { %288 = shalt.err (!%p285_p7)
}
  0x10   :  { %s316_s25 = smov 256   ;;  %s317_s26 = smov 16  }
  0x11   :  { %27 = dma.hbm_to_vmem [thread:$0]  %s384_s2, 1280, %s22_s16, [#allocation4], %s316_s25, %s316_s25, %s317_s26  }
  0x12   :  { %311 = dma.done.wait [#allocation4], 1280  }
  0x13   :  { %312 = vsyncadd [#allocation4], 4294966016  ;;  %v318_v0 = vmov 0   ;;  %v251_v1 = vld [vmem:[#allocation3 + $0x4] ss:$16 sps:$4 sm:$0xff]   ;;  %vm99_vm0 = vcmask 1041408   ;;  %v195_v19 = vstv %s382_s0 }
  0x14   :  { %144 = vmatprep.mubr.bf16.mxu0 %v318_v0  ;;  %185 = vmatprep.mubr.bf16.mxu1 %v318_v0  ;;  %v253_v2 = vld [vmem:[#allocation3 + $0xc] ss:$16 sps:$4 sm:$0xff]   ;;  %v255_v3 = vld [vmem:[#allocation3] ss:$16 sps:$4 sm:$0xff]   ;;  %v256_v4 = vld [vmem:[#allocation3 + $0x8] ss:$16 sps:$4 sm:$0xff]  }
  0x15   :  { %250 = vset.pattern.permute.xlu0 %v318_v0  ;;  %112 = vmatprep.subr.bf16.mxu0 %v251_v1  ;;  %v257_v5 = vld [vmem:[#allocation3 + $0x24] ss:$16 sps:$4 sm:$0xff]   ;;  %v259_v6 = vld [vmem:[#allocation3 + $0x2c] ss:$16 sps:$4 sm:$0xff]   ;;  %v261_v7 = vld [vmem:[#allocation3 + $0x20] ss:$16 sps:$4 sm:$0xff]  }
  0x16   :  { %153 = vmatprep.subr.bf16.mxu1 %v253_v2  ;;  %113 = vmatpush1.bf16.msra.mxu0 %v255_v3  ;;  %v262_v8 = vld [vmem:[#allocation3 + $0x28] ss:$16 sps:$4 sm:$0xff]   ;;  %v43_v9 = vld [vmem:[#allocation3 + $0x40] sm:$0x33]  ;;  %vm95_vm1 = vcmask 293888   ;;  %s319_s7 = smov [#allocation6]  }
  0x17   :  { %154 = vmatpush1.bf16.msra.mxu1 %v256_v4  ;;  %114 = vmatprep.subr.bf16.mxu0 %v257_v5  ;;  %v44_v10 = vld [vmem:[#allocation3 + $0x48] sm:$0x33]  ;;  %v238_v11 = vcombine.high %v43_v9, %v43_v9  ;;  %v237_v13 = vcombine.low %v43_v9, %v43_v9  ;;  %v200_v15 = vld [vmem:[%s385_s3] sm:$0xff]  ;;  %s220_s8 = sshll.u32 %s319_s7, 4  ;;  %s221_s8 = int_to_ptr.vmem [resolvable:$true] %s220_s8 }
  0x18   :  { %155 = vmatprep.subr.bf16.mxu1 %v259_v6  ;;  %v240_v12 = vcombine.high %v44_v10, %v44_v10  ;;  %v239_v14 = vcombine.low %v44_v10, %v44_v10  ;;  %203 = vperm.xlu0 %250, %v200_v15   ;;  %v34_v18 = vld [vmem:[%s383_s1] sm:$0xf]  ;;  %s289_s0 = scalar_lea.vmem %s221_s8, 512  ;;  %p294_p9 = scmp.lt.s32.totalorder %s221_s8, %s221_s8 }
  0x19   :  { %v101_v16 = vsel %vm99_vm0, %v237_v13, 0  ;;  %p290_p8 = scmp.ne.s32.totalorder %s221_s8, %s289_s0  ;;  %p295_p10 = scmp.lt.s32.totalorder %s289_s0, %s289_s0 }
  0x1a   :  { %115 = vmatpush1.bf16.msra.mxu0 %v261_v7  ;;  %v107_v17 = vsel %vm99_vm0, %v239_v14, 0 }
  0x1b   :  { %156 = vmatpush1.bf16.msra.mxu1 %v262_v8  ;;  %241 = vmatprep.subr.msk.bf16.mxu0 %vm99_vm0, %v238_v11  ;;  %p296_p11 = por %p295_p10, %p294_p9 }
  0x1c   :  { %243 = vmatprep.subr.msk.bf16.mxu1 %vm99_vm0, %v240_v12 }
  0x1d   :  { %p297_p12 = pnand %p296_p11, %p290_p8 }
  0x1e   :  { %117 = vmatpush1.bf16.msra.mxu0 %v101_v16 }
  0x1f   :  { %158 = vmatpush1.bf16.msra.mxu1 %v107_v17 }
  0x21   :  { %242 = vmatmul.mubr.msk.bf16.vlgmr.msra.gmra.mrb[0].mxu0 %vm95_vm1, %v34_v18 }
  0x22   :  { %244 = vmatmul.mubr.msk.bf16.vlgmr.msra.gmra.mrb[0].mxu1 %vm95_vm1, %v34_v18 }
  0x97   :  { %v204_v20 = vpop.permute.xlu0 %203 }
  0xf4   :  { %v146_v21 = vpop.f32.mrb[0].mxu0 }
  0xf5   :  { %v187_v22 = vpop.f32.mrb[0].mxu1  ;;  %v196_v23 = vmul.f32 %v195_v19, %v146_v21  ;;  %v148_v25 = vpop.f32.mrb[1].mxu0 }
  0xf6   :  { %v198_v24 = vmul.f32 %v195_v19, %v187_v22  ;;  %v189_v26 = vpop.f32.mrb[1].mxu1  ;;  %v197_v27 = vmul.f32 %v195_v19, %v148_v25  ;;  %v150_v29 = vpop.f32.mrb[2].mxu0 }
  0xf7   :  { %v199_v28 = vmul.f32 %v195_v19, %v189_v26  ;;  %v191_v30 = vpop.f32.mrb[2].mxu1  ;;  %v206_v31 = vadd.f32 %v204_v20, %v196_v23  ;;  %v151_v33 = vpop.f32.mrb[3].mxu0 }
  0xf8   :  { %v208_v32 = vadd.f32 %v204_v20, %v198_v24  ;;  %v192_v34 = vpop.f32.mrb[3].mxu1  ;;  %v207_v35 = vadd.f32 %v204_v20, %v197_v27 }
  0xf9   :  { %v209_v36 = vadd.f32 %v204_v20, %v199_v28  ;;  %210 = vst [vmem:[#allocation6] sm:$0xff] %v206_v31 }
  0xfa   :  { %212 = vst [vmem:[#allocation6 + $0x10] sm:$0xff] %v208_v32  ;;  %211 = vst [vmem:[#allocation6 + $0x8] sm:$0xff] %v207_v35 }
  0xfb   :  { %213 = vst [vmem:[#allocation6 + $0x18] sm:$0xff] %v209_v36 }
  0xfc   :  { %300 = shalt.err (!%p297_p12)
}
  0xfd   :  { %s301_s10 = scalar_lea.hbm %s386_s4, 512 }
  0xfe   :  { %p302_p13 = scmp.ne.s32.totalorder %s386_s4, %s301_s10  ;;  %p305_p0 = scmp.lt.u32.totalorder %s301_s10, %s386_s4 }
 0x100   :  { %p307_p1 = pnand %p305_p0, %p302_p13 }
 0x102   :  { %310 = shalt.err (!%p307_p1)
}
 0x103   :  { %223 = dma.vmem_to_hbm [thread:$0]  %s221_s8, 512, %s386_s4, [#allocation5]  }
 0x104   :  { %313 = dma.done.wait [#allocation5], 512  }
 0x105   :  { %314 = vsyncadd [#allocation5], 4294966784 }
 0x106   :  { %227 = vsyncpa [#allocation4], 1 }
 0x107   :  { %228 = vsyncpa [#allocation5], 1 }

</bundles_post_ra>
